<compile_context>
chip_gen: v7x
topology: tpu7x:2x2x1
jax: 0.10.0
libtpu: 0.0.40
codegen_flags: <defaults>
</compile_context>

<pallas_src>
import jax
import jax.numpy as jnp
from jax.experimental import pallas as pl
from jax.experimental.pallas import tpu as pltpu


_MiB = 1024 * 1024
_VMEM_TILE_BUDGET = 44 * _MiB   # conservative: fits v7x's 64 MiB physical VMEM w/ headroom
_VMEM_LIMIT_BYTES = 56 * _MiB   # raise scoped limit (v5e/v6e default 16/32 MiB); v7x-safe


def _round_up(x, m):
    return ((x + m - 1) // m) * m


# -----------------------------------------------------------------------------
# Kernels: canonical (tm,tk) x (tk,tn) matmul; bias folded into the k==0 init.
# -----------------------------------------------------------------------------

def _linear_kernel_f32_out(x_ref, w_ref, b_ref, o_ref):
    # f32 output: accumulate directly into the (k-resident) output block; no scratch.
    @pl.when(pl.program_id(2) == 0)
    def _():
        o_ref[...] = jnp.broadcast_to(b_ref[...], o_ref.shape)

    o_ref[...] += jnp.dot(x_ref[...], w_ref[...], preferred_element_type=jnp.float32)


def _linear_kernel_acc(x_ref, w_ref, b_ref, o_ref, acc_ref):
    # non-f32 output: f32 VMEM accumulator, single cast in the K-finalize branch.
    k = pl.program_id(2)

    @pl.when(k == 0)
    def _():
        acc_ref[...] = jnp.broadcast_to(b_ref[...], acc_ref.shape)

    acc_ref[...] += jnp.dot(x_ref[...], w_ref[...], preferred_element_type=jnp.float32)

    @pl.when(k == pl.num_programs(2) - 1)
    def _():
        o_ref[...] = acc_ref[...].astype(o_ref.dtype)


# -----------------------------------------------------------------------------
# One-time parameter preparation (hoisted out of the per-call path).
# -----------------------------------------------------------------------------

def prepare_linear_params(weight, bias, *, tn=512, tk=2048, compute_dtype=None):
    """Prepare nn.Linear parameters once: transpose to [K, N], pad, optionally cast.

    weight: [out_dim, in_dim] (PyTorch layout), bias: [out_dim].
    Returns (wT_padded [Kp, Np], bias2d_padded [1, Np] f32, meta dict).
    """
    N, K = weight.shape
    if compute_dtype is None:
        # bf16 inputs (f32 accumulation) for non-trivial shapes; keep dtype for tiny ones.
        compute_dtype = jnp.bfloat16 if (N * K >= 512 * 512) else weight.dtype

    tn = min(tn, _round_up(N, 128))   # lane-dense output tiles (multiple of 128)
    tk = min(tk, _round_up(K, 128))
    Np, Kp = _round_up(N, tn), _round_up(K, tk)

    wT = jnp.transpose(weight).astype(compute_dtype)      # [K, N] -> canonical NN feed
    if (Kp, Np) != (K, N):
        wT = jnp.pad(wT, ((0, Kp - K), (0, Np - N)))       # zero pad: exact math

    b2d = bias.astype(jnp.float32).reshape(1, N)
    if Np != N:
        b2d = jnp.pad(b2d, ((0, 0), (0, Np - N)))

    meta = dict(out_dim=N, in_dim=K, tn=tn, tk=tk, compute_dtype=compute_dtype)
    return wT, b2d, meta


# -----------------------------------------------------------------------------
# Forward pass.
# -----------------------------------------------------------------------------

def _tile_vmem_bytes(tm, tn, tk, in_bytes, out_bytes, use_scratch):
    b = 2 * (tm * tk + tk * tn) * in_bytes   # x + W tiles, double-buffered
    b += 2 * tm * tn * out_bytes             # output tile, double-buffered
    b += 2 * tn * 4                          # bias tile (tiny)
    if use_scratch:
        b += tm * tn * 4                     # f32 accumulator
    return b


def linear_forward(x, wT, bias2d, meta, *, tm=512):
    """y = x @ weight.T + bias, using pre-prepared (transposed/padded) parameters."""
    M, K = x.shape
    assert K == meta["in_dim"], "in_dim mismatch"
    out_dtype = x.dtype
    N = meta["out_dim"]
    Kp, Np = wT.shape
    tn, tk = meta["tn"], meta["tk"]
    compute_dtype = meta["compute_dtype"]

    x = x.astype(compute_dtype)
    tm = min(tm, _round_up(M, 8))
    Mp = _round_up(M, tm)
    if (Mp, Kp) != (M, K):
        x = jnp.pad(x, ((0, Mp - M), (0, Kp - K)))   # padded K contributes zeros

    use_scratch = out_dtype != jnp.float32
    in_bytes = jnp.dtype(compute_dtype).itemsize
    out_bytes = jnp.dtype(out_dtype).itemsize

    # v7x: expose >= 2 "parallel" blocks so both TensorCores get work (no-op on v5e/v6e).
    if Mp // tm == 1 and Np // tn == 1 and tn % 256 == 0:
        tn //= 2

    # Fit the tile set into a chip-agnostic VMEM budget (v7x only has 64 MiB physical).
    while (_tile_vmem_bytes(tm, tn, tk, in_bytes, out_bytes, use_scratch)
           > _VMEM_TILE_BUDGET and tk % 256 == 0):
        tk //= 2
    while (_tile_vmem_bytes(tm, tn, tk, in_bytes, out_bytes, use_scratch)
           > _VMEM_TILE_BUDGET and tn % 256 == 0):
        tn //= 2
    while (_tile_vmem_bytes(tm, tn, tk, in_bytes, out_bytes, use_scratch)
           > _VMEM_TILE_BUDGET and tm % 16 == 0):
        tm //= 2

    grid = (Mp // tm, Np // tn, Kp // tk)

    # Realistic HBM traffic, including re-streaming across the M/N grid axes.
    cost = pl.CostEstimate(
        flops=2 * Mp * Kp * Np,
        transcendentals=0,
        bytes_accessed=(Mp * Kp * (Np // tn)) * in_bytes      # x, re-read per N tile
                       + (Kp * Np * (Mp // tm)) * in_bytes    # W, re-read per M tile
                       + (Np * (Mp // tm)) * 4                # bias
                       + Mp * Np * out_bytes,                 # output
    )

    in_specs = [
        pl.BlockSpec((tm, tk), lambda i, j, k: (i, k)),   # x tile
        pl.BlockSpec((tk, tn), lambda i, j, k: (k, j)),   # W^T tile (canonical NN feed)
        pl.BlockSpec((1, tn), lambda i, j, k: (0, j)),    # bias tile (N only)
    ]
    out_spec = pl.BlockSpec((tm, tn), lambda i, j, k: (i, j))

    if use_scratch:
        kernel = _linear_kernel_acc
        scratch = [pltpu.VMEM((tm, tn), jnp.float32)]
    else:
        kernel = _linear_kernel_f32_out
        scratch = []

    out = pl.pallas_call(
        kernel,
        out_shape=jax.ShapeDtypeStruct((Mp, Np), out_dtype),
        grid_spec=pltpu.PrefetchScalarGridSpec(
            num_scalar_prefetch=0,
            grid=grid,
            in_specs=in_specs,
            out_specs=out_spec,
            scratch_shapes=scratch,
        ),
        compiler_params=pltpu.CompilerParams(
            dimension_semantics=("parallel", "parallel", "arbitrary"),
            vmem_limit_bytes=_VMEM_LIMIT_BYTES,
        ),
        cost_estimate=cost,
    )(x, wT, bias2d)

    if (Mp, Np) != (M, N):
        out = out[:M, :N]
    return out


def single_layer_net(x, weight, bias, *, tm=512, tn=512, tk=2048, compute_dtype=None):
    """One-shot convenience wrapper (prefer prepare_linear_params + linear_forward
    when the layer is applied repeatedly, so weight prep is not re-done per call)."""
    wT, b2d, meta = prepare_linear_params(weight, bias, tn=tn, tk=tk,
                                          compute_dtype=compute_dtype)
    return linear_forward(x, wT, b2d, meta, tm=tm)


if __name__ == "__main__":
    # Small shapes consistent with the module: batch=8, in_dim=32, out_dim=16.
    # (At this size tiles clamp to 8x128 / 128x128 and compute stays f32 so the
    #  reference tolerance is tight; the big-tile / bf16 path kicks in for large shapes.)
    B, IN_DIM, OUT_DIM = 8, 32, 16

    key = jax.random.PRNGKey(0)
    kx, kw, kb = jax.random.split(key, 3)

    x = jax.random.normal(kx, (B, IN_DIM), dtype=jnp.float32)
    bound = 1.0 / (IN_DIM ** 0.5)
    weight = jax.random.uniform(kw, (OUT_DIM, IN_DIM), dtype=jnp.float32,
                                minval=-bound, maxval=bound)
    bias = jax.random.uniform(kb, (OUT_DIM,), dtype=jnp.float32,
                              minval=-bound, maxval=bound)

    # Hoisted parameter preparation (done once), then the forward pass.
    wT, b2d, meta = prepare_linear_params(weight, bias)
    y = linear_forward(x, wT, b2d, meta)
    y = jax.block_until_ready(y)

    # Reference check against plain JAX (same math as nn.Linear).
    y_ref = x @ weight.T + bias
    assert y.shape == (B, OUT_DIM)
    assert jnp.allclose(y, y_ref, atol=1e-5, rtol=1e-5)

    print("KERNEL_OK")
</pallas_src>

<mosaic_0001>
module attributes {stable_mosaic.version = 11 : i64} {
  func.func @_linear_kernel_f32_out(%arg0: i32, %arg1: i32, %arg2: i32, %arg3: memref<8x128xf32, #tpu.memory_space<vmem>>, %arg4: memref<128x128xf32, #tpu.memory_space<vmem>>, %arg5: memref<1x128xf32, #tpu.memory_space<vmem>>, %arg6: memref<8x128xf32, #tpu.memory_space<vmem>>) attributes {dimension_semantics = [#tpu.dimension_semantics<parallel>, #tpu.dimension_semantics<parallel>, #tpu.dimension_semantics<arbitrary>], iteration_bounds = array<i64: 1, 1, 1>, scalar_prefetch = 0 : i64, scratch_operands = 0 : i64, tpu.core_type = #tpu.core_type<tc>, window_params = [{transform_indices = @transform_0, window_bounds = array<i64: 8, 128>}, {transform_indices = @transform_1, window_bounds = array<i64: 128, 128>}, {transform_indices = @transform_2, window_bounds = array<i64: 1, 128>}, {transform_indices = @transform_3, window_bounds = array<i64: 8, 128>}]} {
    %c0_i32 = arith.constant 0 : i32
    %0 = arith.cmpi eq, %arg2, %c0_i32 : i32
    %1 = arith.extui %0 : i1 to i32
    %c0_i32_0 = arith.constant 0 : i32
    %2 = arith.cmpi ne, %1, %c0_i32_0 : i32
    scf.if %2 {
      %c0_8 = arith.constant 0 : index
      %c0_9 = arith.constant 0 : index
      %9 = vector.load %arg5[%c0_8, %c0_9] : memref<1x128xf32, #tpu.memory_space<vmem>>, vector<1x128xf32>
      %10 = vector.shape_cast %9 : vector<1x128xf32> to vector<1x128xf32>
      %11 = vector.broadcast %10 : vector<1x128xf32> to vector<8x128xf32>
      %c0_10 = arith.constant 0 : index
      %c0_11 = arith.constant 0 : index
      %12 = vector.load %arg6[%c0_10, %c0_11] : memref<8x128xf32, #tpu.memory_space<vmem>>, vector<8x128xf32>
      tpu.vector_store %arg6[%c0_10, %c0_11], %11 {strides = array<i32>} : memref<8x128xf32, #tpu.memory_space<vmem>>, vector<8x128xf32>,
    } else {
    }
    %c0 = arith.constant 0 : index
    %c0_1 = arith.constant 0 : index
    %3 = vector.load %arg6[%c0, %c0_1] : memref<8x128xf32, #tpu.memory_space<vmem>>, vector<8x128xf32>
    %c0_2 = arith.constant 0 : index
    %c0_3 = arith.constant 0 : index
    %4 = vector.load %arg3[%c0_2, %c0_3] : memref<8x128xf32, #tpu.memory_space<vmem>>, vector<8x128xf32>
    %c0_4 = arith.constant 0 : index
    %c0_5 = arith.constant 0 : index
    %5 = vector.load %arg4[%c0_4, %c0_5] : memref<128x128xf32, #tpu.memory_space<vmem>>, vector<128x128xf32>
    %cst = arith.constant dense<0.000000e+00> : vector<8x128xf32>
    %6 = tpu.matmul %4, %5, %cst {dimension_numbers = #tpu.dot_dimension_numbers<[1], [0], [0], [1], [0, 0, 1, 1], [], []>} : vector<8x128xf32>, vector<128x128xf32>, vector<8x128xf32> -> vector<8x128xf32>
    %7 = arith.addf %3, %6 : vector<8x128xf32>
    %c0_6 = arith.constant 0 : index
    %c0_7 = arith.constant 0 : index
    %8 = vector.load %arg6[%c0_6, %c0_7] : memref<8x128xf32, #tpu.memory_space<vmem>>, vector<8x128xf32>
    tpu.vector_store %arg6[%c0_6, %c0_7], %7 {strides = array<i32>} : memref<8x128xf32, #tpu.memory_space<vmem>>, vector<8x128xf32>,
    return
  }
  func.func @transform_0(%arg0: i32, %arg1: i32, %arg2: i32) -> (i32, i32) {
    %c0_i32 = arith.constant 0 : i32
    return %arg0, %arg2 : i32, i32
  }
  func.func @transform_1(%arg0: i32, %arg1: i32, %arg2: i32) -> (i32, i32) {
    %c0_i32 = arith.constant 0 : i32
    return %arg2, %arg1 : i32, i32
  }
  func.func @transform_2(%arg0: i32, %arg1: i32, %arg2: i32) -> (i32, i32) {
    %c0_i32 = arith.constant 0 : i32
    %c0_i32_0 = arith.constant 0 : i32
    return %c0_i32, %arg1 : i32, i32
  }
  func.func @transform_3(%arg0: i32, %arg1: i32, %arg2: i32) -> (i32, i32) {
    %c0_i32 = arith.constant 0 : i32
    return %arg0, %arg1 : i32, i32
  }
}

</mosaic_0001>

<bundles_post_ra>
// kernel: tpu_custom_call.1
= control target key start
LH: loop header
LB: loop body
LE: loop exit
PB: predicated region body
PF: predicated region fallthrough
CT: control target
= control target key end

     0   :  { %8 = vsyncpa [#allocation3], 0  ;;  %s390_s0 = inlined_call_operand.hbm [shape: f32[8,128], index: 0, kind: input, shape index: {}]   ;;  %s391_s1 = inlined_call_operand.hbm [shape: f32[128,128], index: 1, kind: input, shape index: {}]   ;;  %s392_s2 = inlined_call_operand.vmem [shape: f32[1,128], index: 2, kind: input, shape index: {}]   ;;  %s393_s3 = inlined_call_operand.hbm [shape: f32[8,128], index: 3, kind: output, shape index: {}]  }
   0x1   :  { %9 = vsyncpa [#allocation6], 0 }
   0x2   :  { %10 = vsyncpa [#allocation4], 0  ;;  %s316_s12 = smov [#allocation2]   ;;  %s317_s14 = smov [#allocation5]  }
   0x3   :  { %s17_s13 = sshll.u32 %s316_s12, 4  ;;  %s26_s15 = sshll.u32 %s317_s14, 4  ;;  %s18_s13 = int_to_ptr.vmem [resolvable:$true] %s17_s13  ;;  %s344_s15 = int_to_ptr.vmem [resolvable:$true] %s26_s15 }
   0x4   :  { %s244_s18 = scalar_lea.hbm %s390_s0, 128 }
   0x5   :  { %p245_p0 = scmp.ne.s32.totalorder %s390_s0, %s244_s18  ;;  %p248_p1 = scmp.lt.u32.totalorder %s244_s18, %s390_s0 }
   0x7   :  { %p250_p2 = pnand %p248_p1, %p245_p0 }
   0x9   :  { %253 = shalt.err (!%p250_p2)
}
   0xa   :  { %s254_s23 = scalar_lea.vmem %s18_s13, 128  ;;  %p259_p4 = scmp.lt.s32.totalorder %s18_s13, %s18_s13 }
   0xb   :  { %p255_p3 = scmp.ne.s32.totalorder %s18_s13, %s254_s23  ;;  %p260_p5 = scmp.lt.s32.totalorder %s254_s23, %s254_s23 }
   0xd   :  { %p261_p6 = por %p260_p5, %p259_p4 }
   0xf   :  { %p262_p7 = pnand %p261_p6, %p255_p3 }
  0x11   :  { %265 = shalt.err (!%p262_p7)
}
  0x12   :  { %20 = dma.hbm_to_vmem [thread:$0]  %s390_s0, 128, %s18_s13, [#allocation3]  }
  0x13   :  { %s266_s28 = scalar_lea.hbm %s391_s1, 2048 }
  0x14   :  { %p267_p8 = scmp.ne.s32.totalorder %s391_s1, %s266_s28  ;;  %p270_p9 = scmp.lt.u32.totalorder %s266_s28, %s391_s1 }
  0x16   :  { %p272_p10 = pnand %p270_p9, %p267_p8 }
  0x18   :  { %275 = shalt.err (!%p272_p10)
}
  0x19   :  { %s276_s6 = scalar_lea.vmem %s344_s15, 2048  ;;  %p281_p12 = scmp.lt.s32.totalorder %s344_s15, %s344_s15 }
  0x1a   :  { %p277_p11 = scmp.ne.s32.totalorder %s344_s15, %s276_s6  ;;  %p282_p13 = scmp.lt.s32.totalorder %s276_s6, %s276_s6 }
  0x1c   :  { %p283_p0 = por %p282_p13, %p281_p12 }
  0x1e   :  { %p284_p1 = pnand %p283_p0, %p277_p11 }
  0x20   :  { %287 = shalt.err (!%p284_p1)
}
  0x21   :  { %s318_s0 = smov 128   ;;  %s319_s7 = smov 8  }
  0x22   :  { %32 = dma.hbm_to_vmem [thread:$0]  %s391_s1, 2048, %s344_s15, [#allocation6], %s318_s0, %s318_s0, %s319_s7  }
  0x23   :  { %310 = dma.done.wait [#allocation3], 128  }
  0x24   :  { %311 = vsyncadd [#allocation3], 4294967168 }
  0x25   :  { %312 = dma.done.wait [#allocation6], 2048  }
  0x26   :  { %313 = vsyncadd [#allocation6], 4294965248  ;;  %v320_v0 = vmov 0.0|0.0   ;;  %vm321_vm0 = vmmov 0   ;;  %v322_v1 = vmov 0.0   ;;  %v55_v2 = vld [vmem:[#allocation5] sm:$0xff] }
  0x27   :  { %212 = vmatprep.subr.bf16.mxu0 %v320_v0  ;;  %209 = vmatprep.mubr.msk.f32.mxu0 %vm321_vm0, %v322_v1  ;;  %v56_v3 = vld [vmem:[#allocation5 + $0x8] sm:$0xff]  ;;  %v57_v4 = vld [vmem:[#allocation5 + $0x10] sm:$0xff]  ;;  %v58_v6 = vld [vmem:[#allocation5 + $0x18] sm:$0xff]  ;;  %s323_s11 = smov [#allocation7]  }
  0x28   :  { %v213_v5 = vpack.c.bf16 %v56_v3, %v55_v2  ;;  %v216_v7 = vpack.c.bf16 %v58_v6, %v57_v4  ;;  %v59_v8 = vld [vmem:[#allocation5 + $0x20] sm:$0xff]  ;;  %v60_v9 = vld [vmem:[#allocation5 + $0x28] sm:$0xff]  ;;  %v61_v11 = vld [vmem:[#allocation5 + $0x30] sm:$0xff]  ;;  %s149_s12 = sshll.u32 %s323_s11, 4  ;;  %s150_s12 = int_to_ptr.vmem [resolvable:$true] %s149_s12 }
  0x29   :  { %v219_v10 = vpack.c.bf16 %v60_v9, %v59_v8  ;;  %v62_v12 = vld [vmem:[#allocation5 + $0x38] sm:$0xff]  ;;  %v63_v14 = vld [vmem:[#allocation5 + $0x40] sm:$0xff]  ;;  %v64_v15 = vld [vmem:[#allocation5 + $0x48] sm:$0xff]  ;;  %s288_s13 = scalar_lea.vmem %s150_s12, 128  ;;  %p293_p3 = scmp.lt.s32.totalorder %s150_s12, %s150_s12 }
  0x2a   :  { %214 = vmatpush3.bf16.msra.mxu0 %v213_v5  ;;  %v222_v13 = vpack.c.bf16 %v62_v12, %v61_v11  ;;  %v225_v16 = vpack.c.bf16 %v64_v15, %v63_v14  ;;  %v65_v17 = vld [vmem:[#allocation5 + $0x50] sm:$0xff]  ;;  %v66_v18 = vld [vmem:[#allocation5 + $0x58] sm:$0xff]  ;;  %v67_v20 = vld [vmem:[#allocation5 + $0x60] sm:$0xff]  ;;  %p289_p2 = scmp.ne.s32.totalorder %s150_s12, %s288_s13  ;;  %p294_p4 = scmp.lt.s32.totalorder %s288_s13, %s288_s13 }
  0x2b   :  { %215 = vmatprep.subr.bf16.mxu0 %v320_v0  ;;  %v228_v19 = vpack.c.bf16 %v66_v18, %v65_v17  ;;  %v68_v21 = vld [vmem:[#allocation5 + $0x68] sm:$0xff]  ;;  %v69_v23 = vld [vmem:[#allocation5 + $0x70] sm:$0xff]  ;;  %v70_v24 = vld [vmem:[#allocation5 + $0x78] sm:$0xff] }
  0x2c   :  { %v231_v22 = vpack.c.bf16 %v68_v21, %v67_v20  ;;  %v234_v25 = vpack.c.bf16 %v70_v24, %v69_v23  ;;  %v54_v26 = vld [vmem:[#allocation2] sm:$0xff]  ;;  %p295_p5 = por %p294_p4, %p293_p3 }
  0x2d   :  { %v159_v27 = vld [vmem:[%s392_s2] ss:$0 sm:$0xff] }
  0x2e   :  { %217 = vmatpush3.bf16.msra.mxu0 %v216_v7  ;;  %p296_p6 = pnand %p295_p5, %p289_p2 }
  0x2f   :  { %218 = vmatprep.subr.bf16.mxu0 %v320_v0 }
  0x32   :  { %220 = vmatpush3.bf16.msra.mxu0 %v219_v10 }
  0x33   :  { %221 = vmatprep.subr.bf16.mxu0 %v320_v0 }
  0x36   :  { %223 = vmatpush3.bf16.msra.mxu0 %v222_v13 }
  0x37   :  { %224 = vmatprep.subr.bf16.mxu0 %v320_v0 }
  0x3a   :  { %226 = vmatpush3.bf16.msra.mxu0 %v225_v16 }
  0x3b   :  { %227 = vmatprep.subr.bf16.mxu0 %v320_v0 }
  0x3e   :  { %229 = vmatpush3.bf16.msra.mxu0 %v228_v19 }
  0x3f   :  { %230 = vmatprep.subr.bf16.mxu0 %v320_v0 }
  0x42   :  { %232 = vmatpush3.bf16.msra.mxu0 %v231_v22 }
  0x43   :  { %233 = vmatprep.subr.bf16.mxu0 %v320_v0 }
  0x46   :  { %235 = vmatpush3.bf16.msra.mxu0 %v234_v25 }
  0x49   :  { %210 = vmatmul.mubr.f32.vlgmr.msra.gmra.mrb[0].mxu0 %v54_v26 }
 0x11c   :  { %v137_v28 = vpop.f32.mrb[0].mxu0 }
 0x11d   :  { %v141_v29 = vadd.f32 %v159_v27, %v137_v28  ;;  %v211_v30 = vpop.f32.mrb[1].mxu0 }
 0x11f   :  { %142 = vst [vmem:[#allocation7] sm:$0xff] %v141_v29 }
 0x120   :  { %299 = shalt.err (!%p296_p6)
}
 0x121   :  { %s300_s16 = scalar_lea.hbm %s393_s3, 128 }
 0x122   :  { %p301_p7 = scmp.ne.s32.totalorder %s393_s3, %s300_s16  ;;  %p304_p8 = scmp.lt.u32.totalorder %s300_s16, %s393_s3 }
 0x124   :  { %p306_p9 = pnand %p304_p8, %p301_p7 }
 0x126   :  { %309 = shalt.err (!%p306_p9)
}
 0x127   :  { %152 = dma.vmem_to_hbm [thread:$0]  %s150_s12, 128, %s393_s3, [#allocation4]  }
 0x128   :  { %314 = dma.done.wait [#allocation4], 128  }
 0x129   :  { %315 = vsyncadd [#allocation4], 4294967168 }
 0x12a   :  { %156 = vsyncpa [#allocation3], 1 }
 0x12b   :  { %157 = vsyncpa [#allocation6], 1 }
 0x12c   :  { %158 = vsyncpa [#allocation4], 1 }

</bundles_post_ra>
